<compile_context>
chip_gen: v7x
topology: tpu7x:2x2x1
jax: 0.10.0
libtpu: 0.0.40
codegen_flags: <defaults>
</compile_context>

<pallas_src>
import functools

import jax
import jax.numpy as jnp
from jax.experimental import pallas as pl
from jax.experimental.pallas import tpu as pltpu

LANE = 128


def _round_up(n, m):
    return ((n + m - 1) // m) * m


def _vae_kernel(x_ref, eps_ref,
                w1_ref, b1_ref,
                wml_ref, bml_ref,
                wd1_ref, bd1_ref,
                wd2_ref, bd2_ref,
                out_ref,
                *, latent_pad, recon_pad):
    x = x_ref[...]
    eps = eps_ref[...]

    # Hoisted bias loads (one per grid step).
    b1 = b1_ref[...]
    bml = bml_ref[...]
    bd1 = bd1_ref[...]
    bd2 = bd2_ref[...]

    # Encoder: Linear(input_dim, hidden_pad) -> ReLU   (padded lanes stay exactly 0)
    h = jnp.dot(x, w1_ref[...], preferred_element_type=jnp.float32) + b1
    h = jnp.maximum(h, 0.0)

    # Fused mean/logvar heads: one (hidden_pad, 2*latent_pad) matmul.
    ml = jnp.dot(h, wml_ref[...], preferred_element_type=jnp.float32) + bml
    mean = ml[:, :latent_pad]      # lanes [0, 128)   -> vreg-aligned view
    logvar = ml[:, latent_pad:]    # lanes [128, 256) -> vreg-aligned view

    # Reparameterize: z = mean + eps * exp(0.5 * logvar)
    # (padded lanes: mean = 0, logvar = 0 -> std = 1, eps = 0 -> z = 0)
    z = mean + eps * jnp.exp(0.5 * logvar)

    # Decoder: Linear(latent_pad, hidden_pad) -> ReLU -> Linear(hidden_pad, input_pad)
    h2 = jnp.dot(z, wd1_ref[...], preferred_element_type=jnp.float32) + bd1
    h2 = jnp.maximum(h2, 0.0)
    recon = jnp.dot(h2, wd2_ref[...], preferred_element_type=jnp.float32) + bd2

    # Epilogue: two 128-aligned, unmasked store streams (no concat temporary).
    out_ref[:, :recon_pad] = recon
    out_ref[:, recon_pad:] = ml


def vae_forward(x, eps, fused_params, *, block_batch=1024, vmem_limit_bytes=48 << 20):
    """x: (B, input_dim) f32, eps: (B, latent_dim) f32 -> (recon, mean, logvar)."""
    B, input_dim = x.shape
    latent_dim = eps.shape[1]
    (w1, b1, wml, bml, wd1, bd1, wd2, bd2) = fused_params
    hidden_pad = w1.shape[1]
    latent_pad = wml.shape[1] // 2
    recon_pad = wd2.shape[1]
    out_width = recon_pad + 2 * latent_pad          # multiple of 128

    # Lane-pad eps so z = mean + eps*std runs on full 128-wide vregs.  eps is only
    # latent_dim wide so this pad is cheap; x is never lane-padded.
    if latent_pad != latent_dim:
        eps = jnp.pad(eps, ((0, 0), (0, latent_pad - latent_dim)))

    # ---- Batch tile: as large as the VMEM budget allows, always a multiple of 8.
    b8 = _round_up(B, 8)
    tb = min(_round_up(block_batch, 8), b8)

    param_bytes = 2 * 4 * sum(int(p.size) for p in fused_params)   # double-buffered

    def _act_bytes(t):   # double-buffered x / eps / out tiles
        return 2 * 4 * t * (input_dim + latent_pad + out_width)

    budget = int(vmem_limit_bytes * 0.75)            # headroom for compiler scratch
    while tb > 8 and param_bytes + _act_bytes(tb) > budget:
        tb = max(8, _round_up(tb // 2, 8))

    b_pad = _round_up(B, tb)
    if b_pad != B:        # only pad the batch when the tile does not divide it
        x = jnp.pad(x, ((0, b_pad - B), (0, 0)))
        eps = jnp.pad(eps, ((0, b_pad - B), (0, 0)))

    grid = (b_pad // tb,)
    kernel = functools.partial(_vae_kernel, latent_pad=latent_pad, recon_pad=recon_pad)

    # Weights/biases: constant (0, 0) index_map -> resident in VMEM across grid steps.
    param_specs = [
        pl.BlockSpec((input_dim, hidden_pad), lambda i: (0, 0)),       # w1
        pl.BlockSpec((1, hidden_pad), lambda i: (0, 0)),               # b1
        pl.BlockSpec((hidden_pad, 2 * latent_pad), lambda i: (0, 0)),  # wml (fused heads)
        pl.BlockSpec((1, 2 * latent_pad), lambda i: (0, 0)),           # bml
        pl.BlockSpec((latent_pad, hidden_pad), lambda i: (0, 0)),      # wd1
        pl.BlockSpec((1, hidden_pad), lambda i: (0, 0)),               # bd1
        pl.BlockSpec((hidden_pad, recon_pad), lambda i: (0, 0)),       # wd2
        pl.BlockSpec((1, recon_pad), lambda i: (0, 0)),                # bd2
    ]

    out = pl.pallas_call(
        kernel,
        out_shape=jax.ShapeDtypeStruct((b_pad, out_width), jnp.float32),
        grid_spec=pltpu.PrefetchScalarGridSpec(
            num_scalar_prefetch=0,
            grid=grid,
            in_specs=[
                pl.BlockSpec((tb, input_dim), lambda i: (i, 0)),   # x (last dim = full array dim)
                pl.BlockSpec((tb, latent_pad), lambda i: (i, 0)),  # eps (128-lane padded)
            ] + param_specs,
            out_specs=pl.BlockSpec((tb, out_width), lambda i: (i, 0)),
        ),
        compiler_params=pltpu.CompilerParams(
            dimension_semantics=("parallel",),     # batch axis shards across TCs (v7x)
            vmem_limit_bytes=vmem_limit_bytes,     # 48 MiB: safe on v7x; raise on v5e/v6e
        ),
    )(x, eps, w1, b1, wml, bml, wd1, bd1, wd2, bd2)

    recon = out[:B, :input_dim]
    mean = out[:B, recon_pad:recon_pad + latent_dim]
    logvar = out[:B, recon_pad + latent_pad:recon_pad + latent_pad + latent_dim]
    return recon, mean, logvar


def init_params(key, input_dim, hidden_dim, latent_dim):
    """PyTorch nn.Linear-style init; weights stored as (in, out) so y = x @ W + b."""
    keys = jax.random.split(key, 10)

    def linear(kw, kb, fan_in, fan_out):
        bound = 1.0 / jnp.sqrt(fan_in)
        w = jax.random.uniform(kw, (fan_in, fan_out), jnp.float32, -bound, bound)
        b = jax.random.uniform(kb, (1, fan_out), jnp.float32, -bound, bound)
        return w, b

    w1, b1 = linear(keys[0], keys[1], input_dim, hidden_dim)     # encoder
    wm, bm = linear(keys[2], keys[3], hidden_dim, latent_dim)    # mean head
    wl, bl = linear(keys[4], keys[5], hidden_dim, latent_dim)    # logvar head
    wd1, bd1 = linear(keys[6], keys[7], latent_dim, hidden_dim)  # decoder l1
    wd2, bd2 = linear(keys[8], keys[9], hidden_dim, input_dim)   # decoder l2
    return (w1, b1, wm, bm, wl, bl, wd1, bd1, wd2, bd2)


def fuse_params(params):
    """Done once, in plain JAX:
      * concatenate the mean/logvar heads into one (hidden, 2*latent_pad) weight/bias
        with mean in lanes [0,128) and logvar in lanes [128,256), and
      * zero-pad every lane (output) dim, and every contraction dim fed by a padded
        activation, up to a 128 multiple so the kernel only uses 128-aligned matmuls,
        vreg-aligned slices, and unmasked stores.  Zero padding is numerically exact."""
    (w1, b1, wm, bm, wl, bl, wd1, bd1, wd2, bd2) = params
    input_dim, hidden_dim = w1.shape
    latent_dim = wm.shape[1]
    hidden_pad = _round_up(hidden_dim, LANE)
    latent_pad = _round_up(latent_dim, LANE)
    input_pad = _round_up(input_dim, LANE)

    def pad2(a, rows, cols):
        return jnp.pad(a, ((0, rows - a.shape[0]), (0, cols - a.shape[1])))

    w1p = pad2(w1, input_dim, hidden_pad)      # x is NOT padded, so K stays input_dim
    b1p = pad2(b1, 1, hidden_pad)
    wmlp = pad2(jnp.concatenate([pad2(wm, hidden_dim, latent_pad),
                                 pad2(wl, hidden_dim, latent_pad)], axis=1),
                hidden_pad, 2 * latent_pad)
    bmlp = jnp.concatenate([pad2(bm, 1, latent_pad), pad2(bl, 1, latent_pad)], axis=1)
    wd1p = pad2(wd1, latent_pad, hidden_pad)
    bd1p = pad2(bd1, 1, hidden_pad)
    wd2p = pad2(wd2, hidden_pad, input_pad)
    bd2p = pad2(bd2, 1, input_pad)
    return (w1p, b1p, wmlp, bmlp, wd1p, bd1p, wd2p, bd2p)


def vae_reference(x, eps, params):
    """Plain-JAX reference (un-fused, un-padded params) for validation."""
    (w1, b1, wm, bm, wl, bl, wd1, bd1, wd2, bd2) = params
    h = jnp.maximum(x @ w1 + b1, 0.0)
    mean = h @ wm + bm
    logvar = h @ wl + bl
    z = mean + eps * jnp.exp(0.5 * logvar)
    h2 = jnp.maximum(z @ wd1 + bd1, 0.0)
    recon = h2 @ wd2 + bd2
    return recon, mean, logvar


if __name__ == "__main__":
    input_dim, hidden_dim, latent_dim = 32, 64, 16
    batch = 64
    block_batch = 32   # 2 grid steps: exercises the batch pipeline / v7x megacore path

    key = jax.random.PRNGKey(0)
    k_x, k_eps, k_params = jax.random.split(key, 3)

    x = jax.random.normal(k_x, (batch, input_dim), jnp.float32)
    # TODO(synk): torch.randn_like is in-forward RNG; eps is drawn here in plain JAX
    # and passed into the kernel so the result is deterministic and checkable.
    eps = jax.random.normal(k_eps, (batch, latent_dim), jnp.float32)
    params = init_params(k_params, input_dim, hidden_dim, latent_dim)
    fused = fuse_params(params)

    recon, mean, logvar = vae_forward(x, eps, fused, block_batch=block_batch)
    jax.block_until_ready((recon, mean, logvar))

    # Correctness check against the plain-JAX reference.
    r_ref, m_ref, lv_ref = vae_reference(x, eps, params)
    assert jnp.allclose(recon, r_ref, atol=1e-4, rtol=1e-4)
    assert jnp.allclose(mean, m_ref, atol=1e-4, rtol=1e-4)
    assert jnp.allclose(logvar, lv_ref, atol=1e-4, rtol=1e-4)

    print("KERNEL_OK")
</pallas_src>

<mosaic_0001>
module attributes {stable_mosaic.version = 11 : i64} {
  func.func @_vae_kernel(%arg0: i32, %arg1: memref<32x32xf32, #tpu.memory_space<vmem>>, %arg2: memref<32x128xf32, #tpu.memory_space<vmem>>, %arg3: memref<32x128xf32, #tpu.memory_space<vmem>>, %arg4: memref<1x128xf32, #tpu.memory_space<vmem>>, %arg5: memref<128x256xf32, #tpu.memory_space<vmem>>, %arg6: memref<1x256xf32, #tpu.memory_space<vmem>>, %arg7: memref<128x128xf32, #tpu.memory_space<vmem>>, %arg8: memref<1x128xf32, #tpu.memory_space<vmem>>, %arg9: memref<128x128xf32, #tpu.memory_space<vmem>>, %arg10: memref<1x128xf32, #tpu.memory_space<vmem>>, %arg11: memref<32x384xf32, #tpu.memory_space<vmem>>) attributes {dimension_semantics = [#tpu.dimension_semantics<parallel>], iteration_bounds = array<i64: 2>, scalar_prefetch = 0 : i64, scratch_operands = 0 : i64, tpu.core_type = #tpu.core_type<tc>, window_params = [{transform_indices = @transform_0, window_bounds = array<i64: 32, 32>}, {transform_indices = @transform_1, window_bounds = array<i64: 32, 128>}, {pipeline_mode = #tpu.pipeline_mode<synchronous>, transform_indices = @transform_2, window_bounds = array<i64: 32, 128>}, {pipeline_mode = #tpu.pipeline_mode<synchronous>, transform_indices = @transform_3, window_bounds = array<i64: 1, 128>}, {pipeline_mode = #tpu.pipeline_mode<synchronous>, transform_indices = @transform_4, window_bounds = array<i64: 128, 256>}, {pipeline_mode = #tpu.pipeline_mode<synchronous>, transform_indices = @transform_5, window_bounds = array<i64: 1, 256>}, {pipeline_mode = #tpu.pipeline_mode<synchronous>, transform_indices = @transform_6, window_bounds = array<i64: 128, 128>}, {pipeline_mode = #tpu.pipeline_mode<synchronous>, transform_indices = @transform_7, window_bounds = array<i64: 1, 128>}, {pipeline_mode = #tpu.pipeline_mode<synchronous>, transform_indices = @transform_8, window_bounds = array<i64: 128, 128>}, {pipeline_mode = #tpu.pipeline_mode<synchronous>, transform_indices = @transform_9, window_bounds = array<i64: 1, 128>}, {transform_indices = @transform_10, window_bounds = array<i64: 32, 384>}]} {
    %c0 = arith.constant 0 : index
    %c0_0 = arith.constant 0 : index
    %0 = vector.load %arg1[%c0, %c0_0] : memref<32x32xf32, #tpu.memory_space<vmem>>, vector<32x32xf32>
    %c0_1 = arith.constant 0 : index
    %c0_2 = arith.constant 0 : index
    %1 = vector.load %arg2[%c0_1, %c0_2] : memref<32x128xf32, #tpu.memory_space<vmem>>, vector<32x128xf32>
    %c0_3 = arith.constant 0 : index
    %c0_4 = arith.constant 0 : index
    %2 = vector.load %arg4[%c0_3, %c0_4] : memref<1x128xf32, #tpu.memory_space<vmem>>, vector<1x128xf32>
    %c0_5 = arith.constant 0 : index
    %c0_6 = arith.constant 0 : index
    %3 = vector.load %arg6[%c0_5, %c0_6] : memref<1x256xf32, #tpu.memory_space<vmem>>, vector<1x256xf32>
    %c0_7 = arith.constant 0 : index
    %c0_8 = arith.constant 0 : index
    %4 = vector.load %arg8[%c0_7, %c0_8] : memref<1x128xf32, #tpu.memory_space<vmem>>, vector<1x128xf32>
    %c0_9 = arith.constant 0 : index
    %c0_10 = arith.constant 0 : index
    %5 = vector.load %arg10[%c0_9, %c0_10] : memref<1x128xf32, #tpu.memory_space<vmem>>, vector<1x128xf32>
    %c0_11 = arith.constant 0 : index
    %c0_12 = arith.constant 0 : index
    %6 = vector.load %arg3[%c0_11, %c0_12] : memref<32x128xf32, #tpu.memory_space<vmem>>, vector<32x128xf32>
    %cst = arith.constant dense<0.000000e+00> : vector<32x128xf32>
    %7 = tpu.matmul %0, %6, %cst {dimension_numbers = #tpu.dot_dimension_numbers<[1], [0], [0], [1], [0, 0, 1, 1], [], []>} : vector<32x32xf32>, vector<32x128xf32>, vector<32x128xf32> -> vector<32x128xf32>
    %8 = vector.broadcast %2 : vector<1x128xf32> to vector<32x128xf32>
    %9 = arith.addf %7, %8 : vector<32x128xf32>
    %cst_13 = arith.constant 0.000000e+00 : f32
    %10 = vector.broadcast %cst_13 : f32 to vector<32x128xf32>
    %11 = arith.maximumf %9, %10 : vector<32x128xf32>
    %c0_14 = arith.constant 0 : index
    %c0_15 = arith.constant 0 : index
    %12 = vector.load %arg5[%c0_14, %c0_15] : memref<128x256xf32, #tpu.memory_space<vmem>>, vector<128x256xf32>
    %cst_16 = arith.constant dense<0.000000e+00> : vector<32x256xf32>
    %13 = tpu.matmul %11, %12, %cst_16 {dimension_numbers = #tpu.dot_dimension_numbers<[1], [0], [0], [1], [0, 0, 1, 1], [], []>} : vector<32x128xf32>, vector<128x256xf32>, vector<32x256xf32> -> vector<32x256xf32>
    %14 = vector.broadcast %3 : vector<1x256xf32> to vector<32x256xf32>
    %15 = arith.addf %13, %14 : vector<32x256xf32>
    %16 = vector.extract_strided_slice %15 {offsets = [0, 0], sizes = [32, 128], strides = [1, 1]} : vector<32x256xf32> to vector<32x128xf32>
    %17 = vector.extract_strided_slice %15 {offsets = [0, 128], sizes = [32, 128], strides = [1, 1]} : vector<32x256xf32> to vector<32x128xf32>
    %cst_17 = arith.constant 5.000000e-01 : f32
    %18 = vector.broadcast %cst_17 : f32 to vector<32x128xf32>
    %19 = arith.mulf %18, %17 : vector<32x128xf32>
    %20 = math.exp %19 : vector<32x128xf32>
    %21 = arith.mulf %1, %20 : vector<32x128xf32>
    %22 = arith.addf %16, %21 : vector<32x128xf32>
    %c0_18 = arith.constant 0 : index
    %c0_19 = arith.constant 0 : index
    %23 = vector.load %arg7[%c0_18, %c0_19] : memref<128x128xf32, #tpu.memory_space<vmem>>, vector<128x128xf32>
    %cst_20 = arith.constant dense<0.000000e+00> : vector<32x128xf32>
    %24 = tpu.matmul %22, %23, %cst_20 {dimension_numbers = #tpu.dot_dimension_numbers<[1], [0], [0], [1], [0, 0, 1, 1], [], []>} : vector<32x128xf32>, vector<128x128xf32>, vector<32x128xf32> -> vector<32x128xf32>
    %25 = vector.broadcast %4 : vector<1x128xf32> to vector<32x128xf32>
    %26 = arith.addf %24, %25 : vector<32x128xf32>
    %cst_21 = arith.constant 0.000000e+00 : f32
    %27 = vector.broadcast %cst_21 : f32 to vector<32x128xf32>
    %28 = arith.maximumf %26, %27 : vector<32x128xf32>
    %c0_22 = arith.constant 0 : index
    %c0_23 = arith.constant 0 : index
    %29 = vector.load %arg9[%c0_22, %c0_23] : memref<128x128xf32, #tpu.memory_space<vmem>>, vector<128x128xf32>
    %cst_24 = arith.constant dense<0.000000e+00> : vector<32x128xf32>
    %30 = tpu.matmul %28, %29, %cst_24 {dimension_numbers = #tpu.dot_dimension_numbers<[1], [0], [0], [1], [0, 0, 1, 1], [], []>} : vector<32x128xf32>, vector<128x128xf32>, vector<32x128xf32> -> vector<32x128xf32>
    %31 = vector.broadcast %5 : vector<1x128xf32> to vector<32x128xf32>
    %32 = arith.addf %30, %31 : vector<32x128xf32>
    %c0_25 = arith.constant 0 : index
    %c0_26 = arith.constant 0 : index
    %33 = vector.load %arg11[%c0_25, %c0_26] : memref<32x384xf32, #tpu.memory_space<vmem>>, vector<32x128xf32>
    tpu.vector_store %arg11[%c0_25, %c0_26], %32 {strides = array<i32>} : memref<32x384xf32, #tpu.memory_space<vmem>>, vector<32x128xf32>,
    %c0_27 = arith.constant 0 : index
    %c128 = arith.constant 128 : index
    %34 = vector.load %arg11[%c0_27, %c128] : memref<32x384xf32, #tpu.memory_space<vmem>>, vector<32x256xf32>
    tpu.vector_store %arg11[%c0_27, %c128], %15 {strides = array<i32>} : memref<32x384xf32, #tpu.memory_space<vmem>>, vector<32x256xf32>,
    return
  }
  func.func @transform_0(%arg0: i32) -> (i32, i32) {
    %c0_i32 = arith.constant 0 : i32
    %c0_i32_0 = arith.constant 0 : i32
    return %arg0, %c0_i32 : i32, i32
  }
  func.func @transform_1(%arg0: i32) -> (i32, i32) {
    %c0_i32 = arith.constant 0 : i32
    %c0_i32_0 = arith.constant 0 : i32
    return %arg0, %c0_i32 : i32, i32
  }
  func.func @transform_2(%arg0: i32) -> (i32, i32) {
    %c0_i32 = arith.constant 0 : i32
    %c0_i32_0 = arith.constant 0 : i32
    %c0_i32_1 = arith.constant 0 : i32
    return %c0_i32, %c0_i32_0 : i32, i32
  }
  func.func @transform_3(%arg0: i32) -> (i32, i32) {
    %c0_i32 = arith.constant 0 : i32
    %c0_i32_0 = arith.constant 0 : i32
    %c0_i32_1 = arith.constant 0 : i32
    return %c0_i32, %c0_i32_0 : i32, i32
  }
  func.func @transform_4(%arg0: i32) -> (i32, i32) {
    %c0_i32 = arith.constant 0 : i32
    %c0_i32_0 = arith.constant 0 : i32
    %c0_i32_1 = arith.constant 0 : i32
    return %c0_i32, %c0_i32_0 : i32, i32
  }
  func.func @transform_5(%arg0: i32) -> (i32, i32) {
    %c0_i32 = arith.constant 0 : i32
    %c0_i32_0 = arith.constant 0 : i32
    %c0_i32_1 = arith.constant 0 : i32
    return %c0_i32, %c0_i32_0 : i32, i32
  }
  func.func @transform_6(%arg0: i32) -> (i32, i32) {
    %c0_i32 = arith.constant 0 : i32
    %c0_i32_0 = arith.constant 0 : i32
    %c0_i32_1 = arith.constant 0 : i32
    return %c0_i32, %c0_i32_0 : i32, i32
  }
  func.func @transform_7(%arg0: i32) -> (i32, i32) {
    %c0_i32 = arith.constant 0 : i32
    %c0_i32_0 = arith.constant 0 : i32
    %c0_i32_1 = arith.constant 0 : i32
    return %c0_i32, %c0_i32_0 : i32, i32
  }
  func.func @transform_8(%arg0: i32) -> (i32, i32) {
    %c0_i32 = arith.constant 0 : i32
    %c0_i32_0 = arith.constant 0 : i32
    %c0_i32_1 = arith.constant 0 : i32
    return %c0_i32, %c0_i32_0 : i32, i32
  }
  func.func @transform_9(%arg0: i32) -> (i32, i32) {
    %c0_i32 = arith.constant 0 : i32
    %c0_i32_0 = arith.constant 0 : i32
    %c0_i32_1 = arith.constant 0 : i32
    return %c0_i32, %c0_i32_0 : i32, i32
  }
  func.func @transform_10(%arg0: i32) -> (i32, i32) {
    %c0_i32 = arith.constant 0 : i32
    %c0_i32_0 = arith.constant 0 : i32
    return %arg0, %c0_i32 : i32, i32
  }
}

</mosaic_0001>

<bundles_post_ra>
// kernel: tpu_custom_call.1
= control target key start
LH: loop header
LB: loop body
LE: loop exit
PB: predicated region body
PF: predicated region fallthrough
CT: control target
= control target key end

     0   :  { %s1891_s0 = inlined_call_operand.vmem [shape: f32[64,32], index: 0, kind: input, shape index: {}]   ;;  %s1892_s1 = inlined_call_operand.vmem [shape: f32[64,128], index: 1, kind: input, shape index: {}]   ;;  %s1893_s2 = inlined_call_operand.vmem [shape: f32[32,128], index: 2, kind: input, shape index: {}]   ;;  %s1894_s3 = inlined_call_operand.vmem [shape: f32[1,128], index: 3, kind: input, shape index: {}]   ;;  %s1895_s4 = inlined_call_operand.hbm [shape: f32[128,256], index: 4, kind: input, shape index: {}]   ;;  %s1896_s5 = inlined_call_operand.vmem [shape: f32[1,256], index: 5, kind: input, shape index: {}]   ;;  %s1897_s6 = inlined_call_operand.hbm [shape: f32[128,128], index: 6, kind: input, shape index: {}]   ;;  %s1898_s7 = inlined_call_operand.vmem [shape: f32[1,128], index: 7, kind: input, shape index: {}]   ;;  %s1899_s8 = inlined_call_operand.hbm [shape: f32[128,128], index: 8, kind: input, shape index: {}]   ;;  %s1900_s9 = inlined_call_operand.vmem [shape: f32[1,128], index: 9, kind: input, shape index: {}]   ;;  %s1901_s10 = inlined_call_operand.hbm [shape: f32[64,384], index: 10, kind: output, shape index: {}]  }
   0x1   :  { %1912 = sst [smem:[#allocation17_spill]] %s1897_s6 }
   0x2   :  { %15 = vsyncpa [#allocation3], 0 }
   0x3   :  { %16 = vsyncpa [#allocation6], 0 }
   0x4   :  { %17 = vsyncpa [#allocation4], 0 }
   0x5   :  { %19 = vsyncpa [#allocation4 + $0x1], 0  ;;  %s1630_s13 = smov 0   ;;  %s1632_s14 = smov 0  }
   0x6   :  { %s1634_s15 = smov 0   ;;  %s1636_s16 = smov 0  }
   0x7 LB: > { %1913 = sst [smem:[#allocation12_spill]] %s1550_s13  ;;  %s1651_s17 = sadd.s32 4294967295, %s1562_s16   ;;  %s1562_s16 = sphi %s1636_s16, %s1935_s16   ;;  %s1558_s15 = sphi %s1634_s15, %s1937_s15   ;;  %s1554_s14 = sphi %s1632_s14, %s1939_s14   ;;  %s1550_s13 = sphi %s1630_s13, %s1938_s13  }
   0x8   : > { %1914 = sst [smem:[#allocation13_spill]] %s1558_s15  ;;  %s1053_s18 = sadd.s32 4294967294, %s1562_s16  }
   0x9   : > { %s1655_s19 = sadd.s32 1, %s1562_s16   ;;  %s252_s20 = sadd.s32 1, %s1558_s15 }
   0xa   : > { %1915 = sst [smem:[#allocation14_spill]] %s1655_s19  ;;  %s249_s21 = ssub.s32 %s1562_s16, %s1655_s19 }
   0xb   : > { %p262_p0 = scmp.ne.s32.totalorder %s1558_s15, %s1554_s14  ;;  %p250_p1 = scmp.eq.s32.totalorder %s249_s21, 0 }
   0xc   : > { %p263_p2 = scmp.eq.s32.totalorder %s1651_s17, 1  ;;  %p268_p3 = scmp.ne.s32.totalorder %s1554_s14, %s1550_s13 }
   0xd   : > { %p269_p4 = scmp.eq.s32.totalorder %s1053_s18, 1  ;;  %p1054_p7 = scmp.ge.s32.totalorder %s1562_s16, 1 }
   0xe   : > { %s1666_s22 = scalar_select %p250_p1, %s1558_s15, %s252_s20  }
   0xf   : > { %p1668_p5 = por %p263_p2, %p262_p0  ;;  %p1672_p6 = por %p269_p4, %p268_p3 }
  0x10   : > { %1916 = sst [smem:[#allocation15_spill]] %s1666_s22  ;;  %p276_p8 = scmp.lt.s32.totalorder %s1562_s16, 3 }
  0x11   : > { %s1917_s23 = scalar_select %p1668_p5, 1, 0 }
  0x12   : > { %s1918_s24 = scalar_select %p1672_p6, 1, 0 }
  0x13   : > { %p1902_p9 = scmp.eq.s32.totalorder %s1651_s17, 0  ;;  %p1679_p10 = pnand %p1054_p7, %p276_p8 }
  0x14   : > { %1919 = sst [smem:[#allocation16_spill]] %s1918_s24  ;;  %s1564_s26 = smov [#allocation5]  }
  0x15   : > { %s1920_s25 = scalar_select %p1679_p10, 1, 0 }
  0x16   : > { %s310_s27 = sshll.u32 %s1564_s26, 4  ;;  %p1337_p11 = pneg %p1679_p10  ;;  %s311_s27 = int_to_ptr.vmem [resolvable:$true] %s310_s27 }
  0x17   : > { %s1565_s29 = smov [#allocation2]   ;;  %s1922_s6 = sld [smem:[#allocation17_spill]] }
  0x18   : > { %p1687_p12 = pnand %p1902_p9, %p1337_p11  ;;  %s294_s30 = sshll.u32 %s1565_s29, 4  ;;  %s1691_s30 = int_to_ptr.vmem [resolvable:$true] %s294_s30 }
  0x1a   : > { %p1701_p0 = pneg %p1687_p12 }
  0x1d   : > { %s1408_s18 = scalar_lea.hbm %s1922_s6, 2048 }
  0x1e   : > { %p1409_p13 = scmp.ne.s32.totalorder %s1922_s6, %s1408_s18  ;;  %p1415_p3 = scmp.lt.u32.totalorder %s1408_s18, %s1922_s6 }
  0x20   : > { %p1411_p1 = pnand %p1701_p0, %p1409_p13 }
  0x22   : > { %p1412_p2 = pneg %p1411_p1 }
  0x24   : > { %p1417_p4 = pnand %p1415_p3, %p1412_p2 }
  0x26   : > { %1420 = shalt.err (!%p1417_p4)
}
  0x27   : > { %s1421_s11 = scalar_lea.vmem %s311_s27, 2048  ;;  %p1429_p9 = scmp.lt.s32.totalorder %s311_s27, %s311_s27 }
  0x28   : > { %p1422_p7 = scmp.ne.s32.totalorder %s311_s27, %s1421_s11  ;;  %p1430_p6 = scmp.lt.s32.totalorder %s1421_s11, %s1421_s11 }
  0x2a   : > { %p1424_p8 = pnand %p1422_p7, %p1701_p0  ;;  %p1431_p5 = por %p1430_p6, %p1429_p9 }
  0x2c   : > { %p1425_p11 = pneg %p1424_p8 }
  0x2e   : > { %p1432_p10 = pnand %p1431_p5, %p1425_p11 }
  0x30   : > { %1435 = shalt.err (!%p1432_p10)
}
  0x31   : > { %s1910_s12 = smov 128   ;;  %s1911_s20 = smov 8  }
  0x32   : > { %1343 = dma.hbm_to_vmem [thread:$0]  (!%p1687_p12), %s1922_s6, 2048, %s311_s27, [#allocation6], %s1910_s12, %s1910_s12, %s1911_s20  }
  0x33   : > { %s1436_s15 = scalar_lea.hbm %s1895_s4, 4096 }
  0x34   : > { %p1437_p5 = scmp.ne.s32.totalorder %s1895_s4, %s1436_s15  ;;  %p1443_p10 = scmp.lt.u32.totalorder %s1436_s15, %s1895_s4 }
  0x36   : > { %p1439_p6 = pnand %p1437_p5, %p1701_p0 }
  0x38   : > { %p1440_p9 = pneg %p1439_p6 }
  0x3a   : > { %p1445_p13 = pnand %p1443_p10, %p1440_p9 }
  0x3c   : > { %1448 = shalt.err (!%p1445_p13)
}
  0x3d   : > { %s1449_s27 = scalar_lea.vmem %s1691_s30, 4096  ;;  %p1457_p4 = scmp.lt.s32.totalorder %s1691_s30, %s1691_s30 }
  0x3e   : > { %p1450_p1 = scmp.ne.s32.totalorder %s1691_s30, %s1449_s27  ;;  %p1458_p7 = scmp.lt.s32.totalorder %s1449_s27, %s1449_s27 }
  0x40   : > { %p1452_p2 = pnand %p1450_p1, %p1701_p0  ;;  %p1459_p8 = por %p1458_p7, %p1457_p4 }
  0x42   : > { %p1453_p3 = pneg %p1452_p2 }
  0x44   : > { %p1460_p11 = pnand %p1459_p8, %p1453_p3 }
  0x46   : > { %1463 = shalt.err (!%p1460_p11)
}
  0x47   : > { %s1568_s19 = smov 256   ;;  %s1569_s13 = smov 16  }
  0x48   : > { %1340 = dma.hbm_to_vmem [thread:$0]  (!%p1687_p12), %s1895_s4, 4096, %s1691_s30, [#allocation3], %s1568_s19, %s1568_s19, %s1569_s13  }
  0x49   : > { %s1570_s22 = smov [#allocation7]   ;;  %s1464_s11 = scalar_lea.hbm %s1899_s8, 2048 }
  0x4a   : > { %s326_s18 = sshll.u32 %s1570_s22, 4  ;;  %p1465_p5 = scmp.ne.s32.totalorder %s1899_s8, %s1464_s11  ;;  %s327_s18 = int_to_ptr.vmem [resolvable:$true] %s326_s18 }
  0x4b   : > { %p1471_p10 = scmp.lt.u32.totalorder %s1464_s11, %s1899_s8 }
  0x4c   : > { %p1467_p6 = pnand %p1465_p5, %p1701_p0 }
  0x4e   : > { %p1468_p9 = pneg %p1467_p6 }
  0x50   : > { %p1473_p13 = pnand %p1471_p10, %p1468_p9 }
  0x52   : > { %1476 = shalt.err (!%p1473_p13)
}
  0x53   : > { %s1477_s30 = scalar_lea.vmem %s327_s18, 2048  ;;  %p1485_p4 = scmp.lt.s32.totalorder %s327_s18, %s327_s18 }
  0x54   : > { %p1478_p1 = scmp.ne.s32.totalorder %s327_s18, %s1477_s30  ;;  %p1486_p7 = scmp.lt.s32.totalorder %s1477_s30, %s1477_s30 }
  0x56   : > { %p1480_p2 = pnand %p1478_p1, %p1701_p0  ;;  %p1487_p8 = por %p1486_p7, %p1485_p4 }
  0x58   : > { %p1481_p3 = pneg %p1480_p2 }
  0x5a   : > { %p1488_p11 = pnand %p1487_p8, %p1481_p3 }
  0x5c   : > { %1491 = shalt.err (!%p1488_p11)
}
  0x5d   : > { %s1924_s12 = smov 8   ;;  %s1925_s19 = smov 128  }
  0x5e   : > { %1346 = dma.hbm_to_vmem [thread:$0]  (!%p1687_p12), %s1899_s8, 2048, %s327_s18, [#allocation6], %s1925_s19, %s1925_s19, %s1924_s12  }
  0x5f   : > { %p1926_p5 = scmp.ne.s32.totalorder %s1920_s25, 0 }
  0x60   : > { %p1927_p0 = scmp.eq.s32.totalorder (!%p1926_p5), %s1651_s17, 0 }
  0x61   : > { %363 = sbr.rel (%p1926_p5) target bundleno = 1030 (0x406), region = 60 }
  0x68   : > { %1537 = dma.done.wait (%p1927_p0), [#allocation3], 4096   ;;  %p1928_p6 = pmov %p1927_p0 }
  0x69   : > { %p1929_p9 = pmov %p1927_p0 }
  0x6a   : > { %1539 = vsyncadd (%p1928_p6), [#allocation3], 4294963200 }
  0x6b   : > { %1541 = dma.done.wait (%p1929_p9), [#allocation6], 4096   ;;  %p1930_p10 = pmov %p1927_p0 }
  0x6c   : > { %s1063_s28 = sshll.u32 %s1651_s17, 2  ;;  %vm449_vm0 = vcmask 261120   ;;  %v439_v0 = vld [vmem:[%s1893_s2] sm:$0xff]  ;;  %v440_v1 = vld [vmem:[%s1893_s2 + $0x8] sm:$0xff]  ;;  %v441_v2 = vld [vmem:[%s1893_s2 + $0x10] sm:$0xff]  ;;  %v1571_v58 = vmov 0.0  }
  0x6d   : > { %1543 = vsyncadd (%p1930_p10), [#allocation6], 4294963200  ;;  %p415_p13 = scmp.lt.s32.totalorder %s1063_s28, 7  ;;  %v1217_v3 = vpack.c.bf16 %v440_v1, %v439_v0  ;;  %v442_v4 = vld [vmem:[%s1893_s2 + $0x18] sm:$0xff]  ;;  %v552_v7 = vld [vmem:[#allocation2 + $0x8] sm:$0xff]  ;;  %658 = vmatprep.mubr.f32.mxu1 %v1571_v58  ;;  %s411_s6 = sand.u32 1, %s1554_s14  }
  0x6e   : > { %v1221_v6 = vpack.c.bf16 %v442_v4, %v441_v2  ;;  %v554_v8 = vld [vmem:[#allocation2 + $0x18] sm:$0xff]  ;;  %v551_v9 = vld [vmem:[#allocation2] sm:$0xff]  ;;  %v553_v11 = vld [vmem:[#allocation2 + $0x10] sm:$0xff]  ;;  %s1321_s13 = smul.u32 96, %s411_s6  ;;  %s1850_s20 = scalar_lea.sflag [#allocation4], %s411_s6 }
  0x6f   : > { %s1941_s28 = smov (!%p415_p13, %s1063_s28), 7  ;;  %1218 = vmatprep.subr.bf16.mxu0 %v1217_v3  ;;  %v1225_v10 = vpack.c.bf16 %v554_v8, %v552_v7  ;;  %v556_v12 = vld [vmem:[#allocation2 + $0x28] sm:$0xff]  ;;  %v558_v13 = vld [vmem:[#allocation2 + $0x38] sm:$0xff]  ;;  %v1227_v14 = vpack.c.bf16 %v553_v11, %v551_v9  ;;  %v555_v16 = vld [vmem:[#allocation2 + $0x20] sm:$0xff]  ;;  %s1322_s11 = smul.u32 1536, %s1651_s17 }
  0x70   : > { %s1064_s25 = sshll.u32 %s1941_s28, 3  ;;  %1220 = vmatpush3.bf16.msra.mxu0 %v1217_v3  ;;  %v1229_v15 = vpack.c.bf16 %v558_v13, %v556_v12  ;;  %v557_v17 = vld [vmem:[#allocation2 + $0x30] sm:$0xff]  ;;  %v560_v18 = vld [vmem:[#allocation2 + $0x48] sm:$0xff]  ;;  %v562_v19 = vld [vmem:[#allocation2 + $0x58] sm:$0xff]  ;;  %p1931_p1 = scmp.ne.s32.totalorder %s1917_s23, 0 }
  0x71   : > { %s1783_s15 = scalar_lea.vmem %s1891_s0, %s1064_s25  ;;  %1222 = vmatprep.subr.bf16.mxu0 %v1221_v6  ;;  %1226 = vmatprep.subr.bf16.mxu1 %v1225_v10  ;;  %v1231_v20 = vpack.c.bf16 %v557_v17, %v555_v16  ;;  %v1233_v22 = vpack.c.bf16 %v562_v19, %v560_v18  ;;  %v559_v23 = vld [vmem:[#allocation2 + $0x40] sm:$0xff]  ;;  %v561_v24 = vld [vmem:[#allocation2 + $0x50] sm:$0xff]  ;;  %v564_v26 = vld [vmem:[#allocation2 + $0x68] sm:$0xff]  ;;  %s424_s18 = scalar_lea.vmem %s1892_s1, %s1064_s25 }
  0x72   : > { %v427_v5 = vld [vmem:[%s1783_s15] sm:$0xff]  ;;  %1228 = vmatpush1.bf16.msra.mxu1 %v1227_v14  ;;  %v428_v21 = vld [vmem:[%s1783_s15 + $0x8] sm:$0xff]  ;;  %v429_v25 = vld [vmem:[%s1783_s15 + $0x10] sm:$0xff]  ;;  %v1235_v28 = vpack.c.bf16 %v561_v24, %v559_v23  ;;  %s1842_s19 = scalar_lea.hbm %s1901_s10, %s1322_s11  ;;  %s1572_s26 = smov [#allocation8]  }
  0x73   : > { %1135 = vmatprep.mubr.msk.f32.mxu0 %vm449_vm0, %v427_v5  ;;  %1230 = vmatprep.subr.bf16.mxu1 %v1229_v15  ;;  %v566_v27 = vld [vmem:[#allocation2 + $0x78] sm:$0xff]  ;;  %v563_v31 = vld [vmem:[#allocation2 + $0x60] sm:$0xff]  ;;  %v565_v32 = vld [vmem:[#allocation2 + $0x70] sm:$0xff] }
  0x74   : > { %1224 = vmatpush3.bf16.msra.mxu0 %v1221_v6  ;;  %v430_v29 = vld [vmem:[%s1783_s15 + $0x18] sm:$0xff]  ;;  %v1237_v30 = vpack.c.bf16 %v566_v27, %v564_v26  ;;  %v568_v33 = vld [vmem:[#allocation2 + $0x88] sm:$0xff]  ;;  %v1239_v35 = vpack.c.bf16 %v565_v32, %v563_v31  ;;  %v567_v37 = vld [vmem:[#allocation2 + $0x80] sm:$0xff]  ;;  %s1814_s15 = scalar_lea.vmem [#allocation8], %s1321_s13  ;;  %s1496_s13 = sshll.u32 %s1572_s26, 4  ;;  %s1497_s13 = int_to_ptr.vmem [resolvable:$false] %s1496_s13 }
  0x75   : > { %v570_v34 = vld [vmem:[#allocation2 + $0x98] sm:$0xff]  ;;  %v569_v38 = vld [vmem:[#allocation2 + $0x90] sm:$0xff]  ;;  %v572_v39 = vld [vmem:[#allocation2 + $0xa8] sm:$0xff]  ;;  %s948_s27 = sshll.u32 %s1814_s15, 4  ;;  %s1498_s24 = scalar_lea.vmem %s1497_s13, 3072  ;;  %s1844_s27 = int_to_ptr.vmem [resolvable:$true] %s948_s27 }
  0x76   : > { %1232 = vmatpush1.bf16.msra.mxu1 %v1231_v20  ;;  %v1241_v36 = vpack.c.bf16 %v570_v34, %v568_v33  ;;  %v574_v40 = vld [vmem:[#allocation2 + $0xb8] sm:$0xff]  ;;  %v1243_v41 = vpack.c.bf16 %v569_v38, %v567_v37  ;;  %v571_v43 = vld [vmem:[#allocation2 + $0xa0] sm:$0xff]  ;;  %v573_v44 = vld [vmem:[#allocation2 + $0xb0] sm:$0xff]  ;;  %s1492_s17 = scalar_lea.vmem %s1844_s27, 1536  ;;  %p1499_p4 = scmp.lt.s32.totalorder %s1844_s27, %s1497_s13 }
  0x77   : > { %1136 = vmatmul.mubr.msk.f32.vlgmr.msra.gmra.mrb[0].mxu0 %vm449_vm0, %v428_v21  ;;  %1234 = vmatprep.subr.bf16.mxu1 %v1233_v22  ;;  %v1245_v42 = vpack.c.bf16 %v574_v40, %v572_v39  ;;  %v576_v45 = vld [vmem:[#allocation2 + $0xc8] sm:$0xff]  ;;  %v578_v46 = vld [vmem:[#allocation2 + $0xd8] sm:$0xff]  ;;  %v1247_v47 = vpack.c.bf16 %v573_v44, %v571_v43  ;;  %v575_v49 = vld [vmem:[#allocation2 + $0xc0] sm:$0xff]  ;;  %p1493_p12 = scmp.ne.s32.totalorder %s1844_s27, %s1492_s17  ;;  %p1500_p7 = scmp.lt.s32.totalorder %s1498_s24, %s1492_s17 }
  0x78   : > { %1138 = vmatprep.mubr.msk.f32.mxu0 %vm449_vm0, %v429_v25  ;;  %v1249_v48 = vpack.c.bf16 %v578_v46, %v576_v45  ;;  %v577_v50 = vld [vmem:[#allocation2 + $0xd0] sm:$0xff]  ;;  %v580_v52 = vld [vmem:[#allocation2 + $0xe8] sm:$0xff]  ;;  %v582_v53 = vld [vmem:[#allocation2 + $0xf8] sm:$0xff] }
  0x79   : > { %v1251_v51 = vpack.c.bf16 %v577_v50, %v575_v49  ;;  %v1253_v54 = vpack.c.bf16 %v582_v53, %v580_v52  ;;  %v579_v55 = vld [vmem:[#allocation2 + $0xe0] sm:$0xff]  ;;  %v581_v56 = vld [vmem:[#allocation2 + $0xf0] sm:$0xff]  ;;  %v704_v60 = vld [vmem:[#allocation5 + $0x8] sm:$0xff]  ;;  %v584_v53 = vlaneseq  ;;  %p1494_p2 = pnand %p1493_p12, %p1931_p1  ;;  %p1501_p8 = por %p1500_p7, %p1499_p4 }
  0x7a   : > { %1236 = vmatpush1.bf16.msra.mxu1 %v1235_v28  ;;  %v1255_v57 = vpack.c.bf16 %v581_v56, %v579_v55  ;;  %v703_v59 = vld [vmem:[#allocation5] sm:$0xff]  ;;  %v705_v61 = vld [vmem:[#allocation5 + $0x10] sm:$0xff]  ;;  %v706_v63 = vld [vmem:[#allocation5 + $0x18] sm:$0xff] }
  0x7b   : > { %1139 = vmatmul.mubr.msk.f32.gmra.mrb[2].mxu0 %vm449_vm0, %v430_v29  ;;  %1238 = vmatprep.subr.bf16.mxu1 %v1237_v30  ;;  %v1257_v62 = vpack.c.bf16 %v704_v60, %v703_v59  ;;  %v1261_v0 = vpack.c.bf16 %v706_v63, %v705_v61  ;;  %v1067_v1 = vld [vmem:[%s1894_s3] ss:$0 sm:$0xff]  ;;  %v708_v15 = vld [vmem:[#allocation5 + $0x28] sm:$0xff]  ;;  %v709_v17 = vld [vmem:[#allocation5 + $0x30] sm:$0xff]  ;;  %p1495_p3 = pneg %p1494_p2 }
  0x7c   : > { %v707_v14 = vld [vmem:[#allocation5 + $0x20] sm:$0xff]  ;;  %v710_v18 = vld [vmem:[#allocation5 + $0x38] sm:$0xff]  ;;  %v712_v21 = vld [vmem:[#allocation5 + $0x48] sm:$0xff] }
  0x7d   : > { %1258 = vmatprep.subr.bf16.mxu0 %v1257_v62  ;;  %v1265_v16 = vpack.c.bf16 %v708_v15, %v707_v14  ;;  %v1269_v19 = vpack.c.bf16 %v710_v18, %v709_v17  ;;  %v711_v20 = vld [vmem:[#allocation5 + $0x40] sm:$0xff]  ;;  %v713_v23 = vld [vmem:[#allocation5 + $0x50] sm:$0xff]  ;;  %v714_v24 = vld [vmem:[#allocation5 + $0x58] sm:$0xff]  ;;  %p1502_p11 = pnand %p1501_p8, %p1495_p3 }
  0x7e   : > { %1240 = vmatpush1.bf16.msra.mxu1 %v1239_v35  ;;  %1260 = vmatpush3.bf16.msra.mxu0 %v1257_v62  ;;  %v1273_v22 = vpack.c.bf16 %v712_v21, %v711_v20  ;;  %v1277_v25 = vpack.c.bf16 %v714_v24, %v713_v23  ;;  %v715_v26 = vld [vmem:[#allocation5 + $0x60] sm:$0xff]  ;;  %v716_v27 = vld [vmem:[#allocation5 + $0x68] sm:$0xff]  ;;  %v717_v29 = vld [vmem:[#allocation5 + $0x70] sm:$0xff] }
  0x7f   : > { %1242 = vmatprep.subr.bf16.mxu1 %v1241_v36  ;;  %1262 = vmatprep.subr.bf16.mxu0 %v1261_v0  ;;  %v1281_v28 = vpack.c.bf16 %v716_v27, %v715_v26  ;;  %v718_v30 = vld [vmem:[#allocation5 + $0x78] sm:$0xff]  ;;  %v814_v32 = vld [vmem:[#allocation7] sm:$0xff]  ;;  %v815_v33 = vld [vmem:[#allocation7 + $0x8] sm:$0xff] }
  0x80   : > { %v1285_v31 = vpack.c.bf16 %v718_v30, %v717_v29  ;;  %v816_v34 = vld [vmem:[#allocation7 + $0x10] sm:$0xff]  ;;  %v1289_v35 = vpack.c.bf16 %v815_v33, %v814_v32  ;;  %v817_v36 = vld [vmem:[#allocation7 + $0x18] sm:$0xff]  ;;  %v818_v38 = vld [vmem:[#allocation7 + $0x20] sm:$0xff] }
  0x81   : > { %v1293_v37 = vpack.c.bf16 %v817_v36, %v816_v34  ;;  %v819_v39 = vld [vmem:[#allocation7 + $0x28] sm:$0xff]  ;;  %v822_v44 = vld [vmem:[#allocation7 + $0x40] sm:$0xff]  ;;  %v433_v27 = vld [vmem:[%s424_s18 + $0x10] sm:$0xff] }
  0x82   : > { %1244 = vmatpush1.bf16.msra.mxu1 %v1243_v41  ;;  %1264 = vmatpush3.bf16.msra.mxu0 %v1261_v0  ;;  %v1297_v40 = vpack.c.bf16 %v819_v39, %v818_v38  ;;  %v820_v41 = vld [vmem:[#allocation7 + $0x30] sm:$0xff]  ;;  %v823_v45 = vld [vmem:[#allocation7 + $0x48] sm:$0xff]  ;;  %v826_v50 = vld [vmem:[#allocation7 + $0x60] sm:$0xff] }
  0x83   : > { %1246 = vmatprep.subr.bf16.mxu1 %v1245_v42  ;;  %1266 = vmatprep.subr.bf16.mxu0 %v1265_v16  ;;  %v821_v42 = vld [vmem:[#allocation7 + $0x38] sm:$0xff]  ;;  %v1305_v46 = vpack.c.bf16 %v823_v45, %v822_v44  ;;  %v436_v56 = vld [vmem:[%s1896_s5] sm:$0x3]  ;;  %v432_v23 = vld [vmem:[%s424_s18 + $0x8] sm:$0xff] }
  0x84   : > { %v1301_v43 = vpack.c.bf16 %v821_v42, %v820_v41  ;;  %v828_v36 = vld [vmem:[#allocation7 + $0x70] sm:$0xff]  ;;  %v1072_v39 = vld [vmem:[%s1898_s7] ss:$0 sm:$0xff] }
  0x86   : > { %1248 = vmatpush1.bf16.msra.mxu1 %v1247_v47  ;;  %1268 = vmatpush3.bf16.msra.mxu0 %v1265_v16  ;;  %v824_v47 = vld [vmem:[#allocation7 + $0x50] sm:$0xff] }
  0x87   : > { %1250 = vmatprep.subr.bf16.mxu1 %v1249_v48  ;;  %1270 = vmatprep.subr.bf16.mxu0 %v1269_v19  ;;  %v825_v48 = vld [vmem:[#allocation7 + $0x58] sm:$0xff] }
  0x88   : > { %v1309_v49 = vpack.c.bf16 %v825_v48, %v824_v47 }
  0x8a   : > { %1252 = vmatpush1.bf16.msra.mxu1 %v1251_v51  ;;  %1272 = vmatpush3.bf16.msra.mxu0 %v1269_v19  ;;  %v827_v51 = vld [vmem:[#allocation7 + $0x68] sm:$0xff]  ;;  %v431_v19 = vld [vmem:[%s424_s18] sm:$0xff] }
  0x8b   : > { %1254 = vmatprep.subr.bf16.mxu1 %v1253_v54  ;;  %1274 = vmatprep.subr.bf16.mxu0 %v1273_v22  ;;  %v1313_v52 = vpack.c.bf16 %v827_v51, %v826_v50  ;;  %v585_v54 = vshrl.u32 %v584_v53, 7 }
  0x8d   : > { %v586_v55 = vsub.s32 0, %v585_v54 }
  0x8e   : > { %1256 = vmatpush1.bf16.msra.mxu1 %v1255_v57  ;;  %1276 = vmatpush3.bf16.msra.mxu0 %v1273_v22  ;;  %v590_v57 = vsub.s32 1, %v585_v54 }
  0x8f   : > { %1278 = vmatprep.subr.bf16.mxu0 %v1277_v25  ;;  %1290 = vmatprep.subr.bf16.mxu1 %v1289_v35 }
  0x90   : > { %v591_v59 = vrot.slane %v436_v56, %v590_v57 }
  0x92   : > { %1280 = vmatpush3.bf16.msra.mxu0 %v1277_v25 }
  0x93   : > { %1282 = vmatprep.subr.bf16.mxu0 %v1281_v28 }
  0x96   : > { %1284 = vmatpush3.bf16.msra.mxu0 %v1281_v28 }
  0x97   : > { %1286 = vmatprep.subr.bf16.mxu0 %v1285_v31 }
  0x9a   : > { %1288 = vmatpush3.bf16.msra.mxu0 %v1285_v31  ;;  %v434_v31 = vld [vmem:[%s424_s18 + $0x18] sm:$0xff] }
 0x14a   : > { %v1137_v2 = vpop.f32.mrb[0].mxu0 }
 0x14b   : > { %v528_v3 = vpop.f32.mrb[1].mxu0  ;;  %v534_v5 = vadd.f32 %v1137_v2, %v1067_v1 }
 0x14c   : > { %v529_v4 = vadd.f32 %v1067_v1, %v528_v3 }
 0x14d   : > { %v548_v10 = vmax.f32 %v534_v5, 0.0 }
 0x14e   : > { %v547_v6 = vmax.f32 %v529_v4, 0.0  ;;  %v1140_v7 = vpop.f32.mrb[2].mxu0 }
 0x14f   : > { %v538_v8 = vpop.f32.mrb[3].mxu0  ;;  %v544_v12 = vadd.f32 %v1140_v7, %v1067_v1 }
 0x150   : > { %659 = vmatmul.mubr.f32.vlgmr.msra.gmra.mrb[0].mxu1 %v547_v6  ;;  %v539_v9 = vadd.f32 %v1067_v1, %v538_v8 }
 0x151   : > { %664 = vmatprep.mubr.f32.mxu1 %v1571_v58  ;;  %v550_v13 = vmax.f32 %v544_v12, 0.0  ;;  %1292 = vmatpush3.bf16.msra.mxu1 %v1289_v35 }
 0x152   : > { %v549_v11 = vmax.f32 %v539_v9, 0.0  ;;  %1294 = vmatprep.subr.bf16.mxu1 %v1293_v37 }
 0x154   : > { %665 = vmatmul.mubr.f32.gmra.mrb[2].mxu1 %v548_v10 }
 0x155   : > { %670 = vmatprep.mubr.f32.mxu1 %v1571_v58  ;;  %1296 = vmatpush3.bf16.msra.mxu1 %v1293_v37  ;;  %v829_v37 = vld [vmem:[#allocation7 + $0x78] sm:$0xff] }
 0x156   : > { %1298 = vmatprep.subr.bf16.mxu1 %v1297_v40  ;;  %v1317_v38 = vpack.c.bf16 %v829_v37, %v828_v36 }
 0x158   : > { %671 = vmatmul.mubr.f32.gmra.mrb[4].mxu1 %v549_v11 }
 0x159   : > { %676 = vmatprep.mubr.f32.mxu1 %v1571_v58  ;;  %1300 = vmatpush3.bf16.msra.mxu1 %v1297_v40  ;;  %v587_v58 = vrot.slane %v436_v56, %v586_v55 }
 0x15a   : > { %1302 = vmatprep.subr.bf16.mxu1 %v1301_v43 }
 0x15c   : > { %677 = vmatmul.mubr.f32.gmra.mrb[6].mxu1 %v550_v13 }
 0x15d   : > { %1304 = vmatpush3.bf16.msra.mxu1 %v1301_v43 }
 0x15e   : > { %1306 = vmatprep.subr.bf16.mxu1 %v1305_v46 }
 0x161   : > { %1308 = vmatpush3.bf16.msra.mxu1 %v1305_v46 }
 0x162   : > { %1310 = vmatprep.subr.bf16.mxu1 %v1309_v49 }
 0x165   : > { %1312 = vmatpush3.bf16.msra.mxu1 %v1309_v49 }
 0x166   : > { %1314 = vmatprep.subr.bf16.mxu1 %v1313_v52 }
 0x169   : > { %1316 = vmatpush3.bf16.msra.mxu1 %v1313_v52  ;;  %v1073_v52 = vld [vmem:[%s1900_s9] ss:$0 sm:$0xff] }
 0x16a   : > { %1318 = vmatprep.subr.bf16.mxu1 %v1317_v38 }
 0x16d   : > { %1320 = vmatpush3.bf16.msra.mxu1 %v1317_v38 }
 0x223   : > { %v660_v60 = vpop.f32.mrb[0].mxu1 }
 0x224   : > { %v661_v61 = vadd.f32 %v660_v60, %v587_v58  ;;  %v662_v62 = vpop.f32.mrb[1].mxu1 }
 0x225   : > { %v663_v63 = vadd.f32 %v662_v62, %v591_v59 }
 0x226   : > { %925 = vst [vmem:[%s1814_s15 + $0x8] sm:$0xff] %v661_v61 }
 0x227   : > { %v683_v0 = vmul.f32 0.5, %v663_v63  ;;  %926 = vst [vmem:[%s1814_s15 + $0x10] sm:$0xff] %v663_v63  ;;  %v666_v1 = vpop.f32.mrb[2].mxu1 }
 0x228   : > { %v667_v2 = vadd.f32 %v666_v1, %v587_v58  ;;  %v668_v3 = vpop.f32.mrb[3].mxu1 }
 0x229   : > { %v687_v4 = vmul.f32 1.442695, %v683_v0  ;;  %v669_v5 = vadd.f32 %v668_v3, %v591_v59 }
 0x22a   : > { %927 = vst [vmem:[%s1814_s15 + $0x20] sm:$0xff] %v667_v2 }
 0x22b   : > { %1400 = vpow2.f32 %v687_v4  ;;  %v684_v6 = vmul.f32 0.5, %v669_v5  ;;  %928 = vst [vmem:[%s1814_s15 + $0x28] sm:$0xff] %v669_v5  ;;  %v672_v7 = vpop.f32.mrb[4].mxu1 }
 0x22c   : > { %v673_v8 = vadd.f32 %v672_v7, %v587_v58  ;;  %v674_v9 = vpop.f32.mrb[5].mxu1 }
 0x22d   : > { %v689_v10 = vmul.f32 1.442695, %v684_v6  ;;  %v675_v11 = vadd.f32 %v674_v9, %v591_v59 }
 0x22e   : > { %929 = vst [vmem:[%s1814_s15 + $0x38] sm:$0xff] %v673_v8 }
 0x22f   : > { %1402 = vpow2.f32 %v689_v10  ;;  %v685_v12 = vmul.f32 0.5, %v675_v11  ;;  %930 = vst [vmem:[%s1814_s15 + $0x40] sm:$0xff] %v675_v11  ;;  %v678_v13 = vpop.f32.mrb[6].mxu1 }
 0x230   : > { %v679_v14 = vadd.f32 %v678_v13, %v587_v58  ;;  %v680_v15 = vpop.f32.mrb[7].mxu1 }
 0x231   : > { %v691_v16 = vmul.f32 1.442695, %v685_v12  ;;  %v681_v17 = vadd.f32 %v680_v15, %v591_v59 }
 0x232   : > { %931 = vst [vmem:[%s1814_s15 + $0x50] sm:$0xff] %v679_v14 }
 0x233   : > { %1404 = vpow2.f32 %v691_v16  ;;  %v686_v18 = vmul.f32 0.5, %v681_v17  ;;  %932 = vst [vmem:[%s1814_s15 + $0x58] sm:$0xff] %v681_v17 }
 0x235   : > { %v1401_v20 = vpop.eup %1400  ;;  %v693_v21 = vmul.f32 1.442695, %v686_v18 }
 0x236   : > { %v695_v22 = vmul.f32 %v1401_v20, %v431_v19 }
 0x237   : > { %1406 = vpow2.f32 %v693_v21 }
 0x238   : > { %v699_v24 = vadd.f32 %v695_v22, %v661_v61 }
 0x239   : > { %v1403_v25 = vpop.eup %1402 }
 0x23a   : > { %1173 = vmatprep.mubr.f32.mxu0 %v699_v24  ;;  %v696_v26 = vmul.f32 %v1403_v25, %v432_v23 }
 0x23c   : > { %v700_v28 = vadd.f32 %v696_v26, %v667_v2 }
 0x23d   : > { %v1405_v29 = vpop.eup %1404 }
 0x23e   : > { %1174 = vmatmul.mubr.f32.vlgmr.msra.gmra.mrb[4].mxu0 %v700_v28  ;;  %v697_v30 = vmul.f32 %v1405_v29, %v433_v27 }
 0x240   : > { %v701_v32 = vadd.f32 %v697_v30, %v673_v8 }
 0x241   : > { %v1407_v33 = vpop.eup %1406 }
 0x242   : > { %1176 = vmatprep.mubr.f32.mxu0 %v701_v32  ;;  %v698_v34 = vmul.f32 %v1407_v33, %v434_v31 }
 0x244   : > { %v702_v35 = vadd.f32 %v698_v34, %v679_v14 }
 0x246   : > { %1177 = vmatmul.mubr.f32.gmra.mrb[6].mxu0 %v702_v35 }
 0x311   : > { %v1175_v40 = vpop.f32.mrb[4].mxu0 }
 0x312   : > { %v797_v41 = vadd.f32 %v1175_v40, %v1072_v39  ;;  %v791_v42 = vpop.f32.mrb[5].mxu0 }
 0x313   : > { %v792_v43 = vadd.f32 %v1072_v39, %v791_v42 }
 0x314   : > { %v811_v45 = vmax.f32 %v797_v41, 0.0 }
 0x315   : > { %v810_v44 = vmax.f32 %v792_v43, 0.0 }
 0x317   : > { %1211 = vmatprep.mubr.f32.mxu1 %v810_v44 }
 0x318   : > { %1212 = vmatmul.mubr.f32.vlgmr.msra.gmra.mrb[8].mxu1 %v811_v45 }
 0x319   : > { %v1178_v46 = vpop.f32.mrb[6].mxu0 }
 0x31a   : > { %v807_v47 = vadd.f32 %v1178_v46, %v1072_v39  ;;  %v801_v48 = vpop.f32.mrb[7].mxu0 }
 0x31b   : > { %v802_v49 = vadd.f32 %v1072_v39, %v801_v48 }
 0x31c   : > { %v813_v51 = vmax.f32 %v807_v47, 0.0 }
 0x31d   : > { %v812_v50 = vmax.f32 %v802_v49, 0.0 }
 0x31f   : > { %1214 = vmatprep.mubr.f32.mxu1 %v812_v50 }
 0x320   : > { %1215 = vmatmul.mubr.f32.gmra.mrb[10].mxu1 %v813_v51 }
 0x3eb   : > { %v1213_v53 = vpop.f32.mrb[8].mxu1 }
 0x3ec   : > { %v908_v54 = vadd.f32 %v1213_v53, %v1073_v52  ;;  %v902_v55 = vpop.f32.mrb[9].mxu1 }
 0x3ed   : > { %v903_v56 = vadd.f32 %v1073_v52, %v902_v55 }
 0x3ee   : > { %922 = vst [vmem:[%s1814_s15 + $0x18] sm:$0xff] %v908_v54 }
 0x3ef   : > { %921 = vst [vmem:[%s1814_s15] sm:$0xff] %v903_v56 }
 0x3f3   : > { %v1216_v57 = vpop.f32.mrb[10].mxu1 }
 0x3f4   : > { %v918_v58 = vadd.f32 %v1216_v57, %v1073_v52  ;;  %v912_v59 = vpop.f32.mrb[11].mxu1 }
 0x3f5   : > { %v913_v60 = vadd.f32 %v1073_v52, %v912_v59 }
 0x3f6   : > { %924 = vst [vmem:[%s1814_s15 + $0x48] sm:$0xff] %v918_v58 }
 0x3f7   : > { %923 = vst [vmem:[%s1814_s15 + $0x30] sm:$0xff] %v913_v60 }
 0x3f8   : > { %1505 = shalt.err (!%p1502_p11)
}
 0x3f9   : > { %s1506_s6 = scalar_lea.hbm %s1842_s19, 1536  ;;  %s1510_s18 = scalar_lea.hbm %s1901_s10, 3072 }
 0x3fa   : > { %p1507_p5 = scmp.ne.s32.totalorder %s1842_s19, %s1506_s6  ;;  %p1511_p9 = scmp.lt.u32.totalorder %s1842_s19, %s1901_s10 }
 0x3fb   : > { %p1512_p10 = scmp.lt.u32.totalorder %s1510_s18, %s1506_s6  ;;  %p1514_p12 = scmp.lt.u32.totalorder %s1506_s6, %s1842_s19 }
 0x3fc   : > { %p1508_p0 = pnand %p1507_p5, %p1931_p1 }
 0x3fd   : > { %p1513_p13 = por %p1512_p10, %p1511_p9 }
 0x3fe   : > { %p1509_p6 = pneg %p1508_p0 }
 0x3ff   : > { %p1515_p2 = por %p1514_p12, %p1513_p13 }
 0x401   : > { %p1516_p3 = pnand %p1515_p2, %p1509_p6 }
 0x403   : > { %1519 = shalt.err (!%p1516_p3)
}
 0x404   : > { %s1573_s21 = smov 384   ;;  %s1574_s29 = smov 24  }
 0x405   : > { %1335 = dma.vmem_to_hbm [thread:$0]  (%p1931_p1), %s1844_s27, 1536, %s1842_s19, %s1850_s20, %s1573_s21, %s1573_s21, %s1574_s29  }
 0x406 PF: > { %s1932_s11 = sld [smem:[#allocation12_spill]]  ;;  %s1933_s30 = sld [smem:[#allocation16_spill]] }
 0x407   : > { %p1357_p4 = scmp.ge.s32.totalorder %s1562_s16, 2 }
 0x40c   : > { %s963_s12 = sand.u32 1, %s1932_s11   ;;  %p1934_p7 = scmp.ne.s32.totalorder %s1933_s30, 0 }
 0x40d   : > { %s964_s17 = scalar_lea.sflag [#allocation4], %s963_s12 }
 0x40e   : > { %p1348_p8 = pnand %p1357_p4, %p1934_p7 }
 0x410   : > { %1545 = dma.done.wait (!%p1348_p8), %s964_s17, 1536  }
 0x411   : > { %1547 = vsyncadd (!%p1348_p8), %s964_s17, 4294965760  ;;  %s1935_s16 = sld [smem:[#allocation14_spill]]  ;;  %s1936_s26 = sld [smem:[#allocation13_spill]] }
 0x412   : > { %s1937_s15 = sld [smem:[#allocation15_spill]]  ;;  %s1938_s13 = smov %s1554_s14 }
 0x417   : > { %p22_p11 = scmp.ge.s32.totalorder %s1935_s16, 4   ;;  %s1939_s14 = smov %s1936_s26 }
 0x419   :  { %24 = sbr.rel (!%p22_p11) target bundleno = 7 (0x7), region = 111 }
 0x420   :  { %969 = vsyncpa [#allocation3], 1 }
 0x421   :  { %971 = vsyncpa [#allocation3 + $0x1], 1 }
 0x422   :  { %972 = vsyncpa [#allocation6], 1 }
 0x423   :  { %973 = vsyncpa [#allocation4], 1 }
 0x424   :  { %975 = vsyncpa [#allocation4 + $0x1], 1 }

</bundles_post_ra>
